<compile_context>
chip_gen: v5e
topology: v5e:2x2
jax: 0.10.0
libtpu: 0.0.40
codegen_flags: <defaults>
</compile_context>

<pallas_src>
import functools

import jax
import jax.numpy as jnp
from jax import lax
from jax.experimental import pallas as pl
from jax.experimental.pallas import tpu as pltpu

BN_EPS = 1e-5
_MAX_SAMPLES_PER_TILE = 8      # static in-kernel unroll over samples within one grid step


# ------------------------------------------------------------------ hardware-aware budgets

@functools.lru_cache(maxsize=None)
def _vmem_limit_bytes():
    """Generation-aware scoped-VMEM request: use most of the 128 MiB on v5e/v6e, stay inside
    v7x's 64 MiB physical VMEM, and fall back conservatively when the query is unavailable
    (e.g. interpret mode off-TPU)."""
    try:
        phys = pltpu.get_tpu_info().vmem_capacity_bytes
    except Exception:
        phys = 64 * 1024 * 1024
    return int(max(32 * 1024 * 1024, min(phys * 3 // 4, 100 * 1024 * 1024)))


def _pick_tile_n(N, Cin, Cout, L, vmem_limit, max_tile_n):
    """Samples per grid step.  The last two block dims (C, L) always equal the full array dims
    so any tile_n is layout-legal; require tile_n | N (partial tiles would corrupt the BN
    statistics) and budget double-buffered I/O slabs + temporaries against scoped VMEM."""
    lane = max(L, 128)                               # lane-padding floor
    sub = lambda c: ((c + 7) // 8) * 8               # sublane-padding floor
    per_sample = 4 * lane * (sub(Cin) + 3 * sub(Cout)) * 4   # generous bytes/sample estimate
    fit = max(1, int((vmem_limit // 3) // per_sample))
    tile_n = max(1, min(N, fit, max_tile_n))
    while N % tile_n:
        tile_n -= 1
    return tile_n


# ----------------------------------------------------------------------------- kernel helpers

def _conv3(x, wf):
    """Conv1d(k=3, pad=1) on one sample in (C, L) layout (channels on sublanes, positions on
    lanes).  Taps are built with lane slicing + a zero edge column.  Small C uses one wide-K
    matmul W(Cout, 3C) @ xcat(3C, L); C >= 128 uses three accumulating dots to avoid the
    (3C, L) concat temporary.  The conv bias is intentionally dropped: it is cancelled exactly
    by the training-mode BatchNorm mean subtraction that follows."""
    cin, L = x.shape
    mm_dtype = wf.dtype
    z = jnp.zeros((cin, 1), x.dtype)
    xl = jnp.concatenate([z, x[:, :L - 1]], axis=1)          # x[l-1], zero at l = 0
    xr = jnp.concatenate([x[:, 1:], z], axis=1)              # x[l+1], zero at l = L-1
    if cin < 128:
        xcat = jnp.concatenate([xl, x, xr], axis=0).astype(mm_dtype)   # (3C, L)
        return jnp.dot(wf, xcat, preferred_element_type=jnp.float32)
    h = jnp.dot(wf[:, :cin], xl.astype(mm_dtype), preferred_element_type=jnp.float32)
    h = h + jnp.dot(wf[:, cin:2 * cin], x.astype(mm_dtype), preferred_element_type=jnp.float32)
    h = h + jnp.dot(wf[:, 2 * cin:], xr.astype(mm_dtype), preferred_element_type=jnp.float32)
    return h


def _stats2(h):
    """Per-channel [sum, sum-of-squares] as a (C, 2) f32 block (channels stay on sublanes)."""
    return jnp.concatenate([jnp.sum(h, axis=1, keepdims=True),
                            jnp.sum(h * h, axis=1, keepdims=True)], axis=1)


# ----------------------------------------------------------------------------- stage kernels

def _make_stage1_kernel(tile_n, has_proj):
    """conv1 per sample (writes h1) + per-tile bn1 partial stats (+ shortcut-conv stats)."""
    def kernel(*refs):
        if has_proj:
            x_ref, w1_ref, wsc_ref, h1_ref, st1_ref, stsc_ref = refs
        else:
            x_ref, w1_ref, h1_ref, st1_ref = refs
        w1 = w1_ref[...]
        cout = w1.shape[0]
        st1 = jnp.zeros((cout, 2), jnp.float32)
        if has_proj:
            wsc = wsc_ref[...]
            stsc = jnp.zeros((cout, 2), jnp.float32)
        for i in range(tile_n):                       # static unroll; tile_n kept small (<= 8)
            x = x_ref[i]                              # (Cin, L) f32
            h1 = _conv3(x, w1)                        # (Cout, L) f32
            h1_ref[i] = h1.astype(h1_ref.dtype)       # bf16 HBM intermediate on the bf16 path
            st1 = st1 + _stats2(h1)                   # stats from the pre-cast f32 value
            if has_proj:
                # 1x1 shortcut conv: only its BN statistics are needed now; the cheap matmul
                # is recomputed in stage 3 instead of round-tripping through HBM.
                sc = jnp.dot(wsc, x.astype(wsc.dtype), preferred_element_type=jnp.float32)
                stsc = stsc + _stats2(sc)
        st1_ref[0] = st1
        if has_proj:
            stsc_ref[0] = stsc
    return kernel


def _make_stage2_kernel(tile_n):
    """bn1 folded FMA + ReLU + conv2 per sample; emits ONLY per-tile bn2 partial stats
    (no h2 HBM round trip -- stage 3 recomputes conv2 from h1)."""
    def kernel(h1_ref, s1_ref, b1_ref, w2_ref, st2_ref):
        w2 = w2_ref[...]
        s1, b1 = s1_ref[...], b1_ref[...]             # (Cout, 1) f32, broadcast across lanes
        cout = w2.shape[0]
        st2 = jnp.zeros((cout, 2), jnp.float32)
        for i in range(tile_n):
            a = jnp.maximum(h1_ref[i].astype(jnp.float32) * s1 + b1, 0.0)
            st2 = st2 + _stats2(_conv3(a, w2))
        st2_ref[0] = st2
    return kernel


def _make_stage3_kernel(tile_n, has_proj):
    """bn1 FMA + ReLU + conv2 (recomputed) + bn2 FMA + shortcut (+ its BN) + add + ReLU."""
    def kernel(*refs):
        if has_proj:
            (h1_ref, x_ref, s1_ref, b1_ref, w2_ref, s2_ref, b2_ref,
             wsc_ref, ssc_ref, bsc_ref, out_ref) = refs
        else:
            h1_ref, x_ref, s1_ref, b1_ref, w2_ref, s2_ref, b2_ref, out_ref = refs
        w2 = w2_ref[...]
        s1, b1 = s1_ref[...], b1_ref[...]
        s2, b2 = s2_ref[...], b2_ref[...]
        if has_proj:
            wsc = wsc_ref[...]
            ssc, bsc = ssc_ref[...], bsc_ref[...]
        for i in range(tile_n):
            a = jnp.maximum(h1_ref[i].astype(jnp.float32) * s1 + b1, 0.0)
            y = _conv3(a, w2) * s2 + b2
            x = x_ref[i]
            if has_proj:
                sc = jnp.dot(wsc, x.astype(wsc.dtype), preferred_element_type=jnp.float32)
                sc = sc * ssc + bsc
            else:
                sc = x.astype(jnp.float32)
            out_ref[i] = jnp.maximum(y + sc, 0.0).astype(out_ref.dtype)
    return kernel


# ----------------------------------------------------------------------------- wrapper

def _fold_bn(st, count, gamma, beta):
    """Training-mode BN (biased variance) folded into one per-channel FMA: y*scale + shift."""
    mean = st[:, 0] / count
    var = st[:, 1] / count - mean * mean
    scale = gamma * lax.rsqrt(var + BN_EPS)
    shift = beta - mean * scale
    return (scale.reshape(-1, 1).astype(jnp.float32),
            shift.reshape(-1, 1).astype(jnp.float32))


@functools.partial(jax.jit, static_argnames=("use_bf16_matmul", "max_tile_n"))
def residual_block_1d(x_ncl, params, use_bf16_matmul=False, max_tile_n=_MAX_SAMPLES_PER_TILE):
    N, Cin, L = x_ncl.shape
    Cout = params["w1"].shape[0]
    has_proj = Cin != Cout
    mm_dtype = jnp.bfloat16 if use_bf16_matmul else jnp.float32
    # bf16 h1 HBM intermediate halves the dominant intermediate traffic; tied to the bf16 MXU
    # path so the pure-f32 path stays tight against the reference (enable on v6e/v7x).
    h1_dtype = jnp.bfloat16 if use_bf16_matmul else jnp.float32

    vmem_limit = _vmem_limit_bytes()
    tile_n = _pick_tile_n(N, Cin, Cout, L, vmem_limit, max_tile_n)
    n_tiles = N // tile_n
    count = float(N * L)

    # Fused conv weights (PyTorch (O, I, K) -> (O, K*I)) so one matmul covers all 3 taps.
    w1f = jnp.transpose(params["w1"], (0, 2, 1)).reshape(Cout, 3 * Cin).astype(mm_dtype)
    w2f = jnp.transpose(params["w2"], (0, 2, 1)).reshape(Cout, 3 * Cout).astype(mm_dtype)
    wscf = params["wsc"][:, :, 0].astype(mm_dtype) if has_proj else None       # (Cout, Cin)

    cp = pltpu.CompilerParams(dimension_semantics=("parallel",),
                              vmem_limit_bytes=vmem_limit)

    def const(shape):
        # constant index_map -> block stays VMEM-resident across grid steps (no per-step DMA)
        return pl.BlockSpec(shape, lambda i: (0,) * len(shape))

    x_spec = pl.BlockSpec((tile_n, Cin, L), lambda i: (i, 0, 0))
    h1_spec = pl.BlockSpec((tile_n, Cout, L), lambda i: (i, 0, 0))
    out_spec = pl.BlockSpec((tile_n, Cout, L), lambda i: (i, 0, 0))
    st_spec = pl.BlockSpec((1, Cout, 2), lambda i: (i, 0, 0))       # per-tile partial stats
    st_shape = jax.ShapeDtypeStruct((n_tiles, Cout, 2), jnp.float32)

    # -------- stage 1: conv1 (+ bn1 / shortcut partial stats), writes h1 ----------------------
    in_specs1 = [x_spec, const((Cout, 3 * Cin))]
    args1 = [x_ncl, w1f]
    out_shapes1 = [jax.ShapeDtypeStruct((N, Cout, L), h1_dtype), st_shape]
    out_specs1 = [h1_spec, st_spec]
    if has_proj:
        in_specs1.append(const((Cout, Cin)))
        args1.append(wscf)
        out_shapes1.append(st_shape)
        out_specs1.append(st_spec)

    res1 = pl.pallas_call(
        _make_stage1_kernel(tile_n, has_proj),
        grid_spec=pltpu.PrefetchScalarGridSpec(
            num_scalar_prefetch=0, grid=(n_tiles,),
            in_specs=in_specs1, out_specs=tuple(out_specs1)),
        out_shape=tuple(out_shapes1),
        compiler_params=cp,
    )(*args1)
    if has_proj:
        h1, st1p, stscp = res1
    else:
        h1, st1p = res1

    scale1, shift1 = _fold_bn(st1p.sum(axis=0), count, params["g1"], params["be1"])

    # -------- stage 2: bn1 FMA + ReLU + conv2 -> bn2 partial stats only -----------------------
    st2p = pl.pallas_call(
        _make_stage2_kernel(tile_n),
        grid_spec=pltpu.PrefetchScalarGridSpec(
            num_scalar_prefetch=0, grid=(n_tiles,),
            in_specs=[h1_spec, const((Cout, 1)), const((Cout, 1)), const((Cout, 3 * Cout))],
            out_specs=st_spec),
        out_shape=st_shape,
        compiler_params=cp,
    )(h1, scale1, shift1, w2f)

    scale2, shift2 = _fold_bn(st2p.sum(axis=0), count, params["g2"], params["be2"])

    # -------- stage 3: bn1+ReLU + conv2 (recomputed) + bn2 + shortcut + add + ReLU ------------
    in_specs3 = [h1_spec, x_spec, const((Cout, 1)), const((Cout, 1)),
                 const((Cout, 3 * Cout)), const((Cout, 1)), const((Cout, 1))]
    args3 = [h1, x_ncl, scale1, shift1, w2f, scale2, shift2]
    if has_proj:
        scalesc, shiftsc = _fold_bn(stscp.sum(axis=0), count, params["gsc"], params["besc"])
        in_specs3 += [const((Cout, Cin)), const((Cout, 1)), const((Cout, 1))]
        args3 += [wscf, scalesc, shiftsc]

    out = pl.pallas_call(
        _make_stage3_kernel(tile_n, has_proj),
        grid_spec=pltpu.PrefetchScalarGridSpec(
            num_scalar_prefetch=0, grid=(n_tiles,),
            in_specs=in_specs3, out_specs=out_spec),
        out_shape=jax.ShapeDtypeStruct((N, Cout, L), jnp.float32),
        compiler_params=cp,
    )(*args3)
    return out


# ----------------------------------------------------------------------------- params & reference

def init_params(key, in_c, out_c):
    """Deterministic synthetic parameters in PyTorch layouts.  Conv biases are kept so the
    reference matches nn.Conv1d exactly; the kernel drops them (cancelled by training-mode BN)."""
    ks = jax.random.split(key, 6)
    p = {
        "w1": 0.2 * jax.random.normal(ks[0], (out_c, in_c, 3), jnp.float32),   # (O, I, K)
        "b1": 0.1 * jax.random.normal(ks[1], (out_c,), jnp.float32),
        "g1": jnp.ones((out_c,), jnp.float32),
        "be1": jnp.zeros((out_c,), jnp.float32),
        "w2": 0.2 * jax.random.normal(ks[2], (out_c, out_c, 3), jnp.float32),
        "b2": 0.1 * jax.random.normal(ks[3], (out_c,), jnp.float32),
        "g2": jnp.ones((out_c,), jnp.float32),
        "be2": jnp.zeros((out_c,), jnp.float32),
    }
    if in_c != out_c:
        p["wsc"] = 0.2 * jax.random.normal(ks[4], (out_c, in_c, 1), jnp.float32)
        p["bsc"] = 0.1 * jax.random.normal(ks[5], (out_c,), jnp.float32)
        p["gsc"] = jnp.ones((out_c,), jnp.float32)
        p["besc"] = jnp.zeros((out_c,), jnp.float32)
    return p


def reference(x_ncl, params):
    """Pure-JAX reference replicating the PyTorch forward (training-mode BN)."""
    def conv1d(x, w, b, pad):
        y = lax.conv_general_dilated(x, w, window_strides=(1,), padding=[(pad, pad)],
                                     dimension_numbers=("NCH", "OIH", "NCH"))
        return y + b[None, :, None]

    def bn(x, g, be):
        mean = jnp.mean(x, axis=(0, 2), keepdims=True)
        var = jnp.mean((x - mean) ** 2, axis=(0, 2), keepdims=True)
        return (x - mean) * lax.rsqrt(var + BN_EPS) * g[None, :, None] + be[None, :, None]

    h = jax.nn.relu(bn(conv1d(x_ncl, params["w1"], params["b1"], 1), params["g1"], params["be1"]))
    y = bn(conv1d(h, params["w2"], params["b2"], 1), params["g2"], params["be2"])
    if "wsc" in params:
        sc = bn(conv1d(x_ncl, params["wsc"], params["bsc"], 0), params["gsc"], params["besc"])
    else:
        sc = x_ncl
    return jax.nn.relu(y + sc)


if __name__ == "__main__":
    key = jax.random.PRNGKey(0)
    kx, kp, kx2, kp2 = jax.random.split(key, 4)

    # TODO(synk): BatchNorm running_mean/running_var updates (a training-time side effect) are
    # not tracked; they do not affect the forward output in training mode.

    # -- projection-shortcut case (in_c != out_c) ----------------------------------------------
    N, Cin, Cout, L = 2, 4, 8, 16
    x = jax.random.normal(kx, (N, Cin, L), jnp.float32)
    params = init_params(kp, Cin, Cout)
    ref = reference(x, params)

    # 1) default tiling, f32 MXU operands + f32 intermediates
    out = jax.block_until_ready(residual_block_1d(x, params))
    assert out.shape == (N, Cout, L)
    if not jnp.allclose(out, ref, atol=1e-4, rtol=1e-4):
        raise AssertionError("f32 kernel output mismatch vs JAX reference")

    # 2) forced multi-tile grid (exercises per-tile partial BN stats + cross-tile reduction)
    out_t = jax.block_until_ready(residual_block_1d(x, params, max_tile_n=1))
    if not jnp.allclose(out_t, ref, atol=1e-4, rtol=1e-4):
        raise AssertionError("tiled kernel output mismatch vs JAX reference")

    # 3) bf16 MXU operands + bf16 h1 HBM intermediate (v6e/v7x fast path) -- looser tolerance
    out_bf = jax.block_until_ready(residual_block_1d(x, params, use_bf16_matmul=True))
    if not jnp.allclose(out_bf, ref, atol=5e-2, rtol=5e-2):
        raise AssertionError("bf16 kernel output mismatch vs JAX reference")

    # -- identity-shortcut case (in_c == out_c) -------------------------------------------------
    xi = jax.random.normal(kx2, (N, Cout, L), jnp.float32)
    pi = init_params(kp2, Cout, Cout)
    out_i = jax.block_until_ready(residual_block_1d(xi, pi))
    if not jnp.allclose(out_i, reference(xi, pi), atol=1e-4, rtol=1e-4):
        raise AssertionError("identity-shortcut kernel output mismatch vs JAX reference")

    print("KERNEL_OK")
</pallas_src>

<mosaic_0001>
module attributes {stable_mosaic.version = 11 : i64} {
  func.func @kernel(%arg0: i32, %arg1: memref<2x4x16xf32, #tpu.memory_space<vmem>>, %arg2: memref<8x12xf32, #tpu.memory_space<vmem>>, %arg3: memref<8x4xf32, #tpu.memory_space<vmem>>, %arg4: memref<2x8x16xf32, #tpu.memory_space<vmem>>, %arg5: memref<1x8x2xf32, #tpu.memory_space<vmem>>, %arg6: memref<1x8x2xf32, #tpu.memory_space<vmem>>) attributes {dimension_semantics = [#tpu.dimension_semantics<parallel>], iteration_bounds = array<i64: 1>, scalar_prefetch = 0 : i64, scratch_operands = 0 : i64, tpu.core_type = #tpu.core_type<tc>, window_params = [{transform_indices = @transform_0, window_bounds = array<i64: 2, 4, 16>}, {pipeline_mode = #tpu.pipeline_mode<synchronous>, transform_indices = @transform_1, window_bounds = array<i64: 8, 12>}, {pipeline_mode = #tpu.pipeline_mode<synchronous>, transform_indices = @transform_2, window_bounds = array<i64: 8, 4>}, {transform_indices = @transform_3, window_bounds = array<i64: 2, 8, 16>}, {transform_indices = @transform_4, window_bounds = array<i64: 1, 8, 2>}, {transform_indices = @transform_5, window_bounds = array<i64: 1, 8, 2>}]} {
    %c0 = arith.constant 0 : index
    %c0_0 = arith.constant 0 : index
    %0 = vector.load %arg2[%c0, %c0_0] : memref<8x12xf32, #tpu.memory_space<vmem>>, vector<8x12xf32>
    %cst = arith.constant 0.000000e+00 : f32
    %1 = vector.broadcast %cst : f32 to vector<8x2xf32>
    %c0_1 = arith.constant 0 : index
    %c0_2 = arith.constant 0 : index
    %2 = vector.load %arg3[%c0_1, %c0_2] : memref<8x4xf32, #tpu.memory_space<vmem>>, vector<8x4xf32>
    %cst_3 = arith.constant 0.000000e+00 : f32
    %3 = vector.broadcast %cst_3 : f32 to vector<8x2xf32>
    %c0_4 = arith.constant 0 : index
    %c0_5 = arith.constant 0 : index
    %c0_6 = arith.constant 0 : index
    %4 = vector.load %arg1[%c0_4, %c0_5, %c0_6] : memref<2x4x16xf32, #tpu.memory_space<vmem>>, vector<1x4x16xf32>
    %5 = vector.shape_cast %4 : vector<1x4x16xf32> to vector<4x16xf32>
    %cst_7 = arith.constant 0.000000e+00 : f32
    %6 = vector.broadcast %cst_7 : f32 to vector<4x1xf32>
    %7 = vector.extract_strided_slice %5 {offsets = [0, 0], sizes = [4, 15], strides = [1, 1]} : vector<4x16xf32> to vector<4x15xf32>
    %8 = tpu.concatenate %6, %7 in 1 : vector<4x1xf32>, vector<4x15xf32> -> vector<4x16xf32>
    %9 = vector.extract_strided_slice %5 {offsets = [0, 1], sizes = [4, 15], strides = [1, 1]} : vector<4x16xf32> to vector<4x15xf32>
    %10 = tpu.concatenate %9, %6 in 1 : vector<4x15xf32>, vector<4x1xf32> -> vector<4x16xf32>
    %11 = tpu.concatenate %8, %5, %10 in 0 : vector<4x16xf32>, vector<4x16xf32>, vector<4x16xf32> -> vector<12x16xf32>
    %cst_8 = arith.constant dense<0.000000e+00> : vector<8x16xf32>
    %12 = tpu.matmul %0, %11, %cst_8 {dimension_numbers = #tpu.dot_dimension_numbers<[1], [0], [0], [1], [0, 0, 1, 1], [], []>} : vector<8x12xf32>, vector<12x16xf32>, vector<8x16xf32> -> vector<8x16xf32>
    %c0_9 = arith.constant 0 : index
    %c0_10 = arith.constant 0 : index
    %c0_11 = arith.constant 0 : index
    %13 = vector.load %arg4[%c0_9, %c0_10, %c0_11] : memref<2x8x16xf32, #tpu.memory_space<vmem>>, vector<1x8x16xf32>
    %14 = vector.shape_cast %13 : vector<1x8x16xf32> to vector<8x16xf32>
    %15 = vector.shape_cast %12 : vector<8x16xf32> to vector<1x8x16xf32>
    tpu.vector_store %arg4[%c0_9, %c0_10, %c0_11], %15 {strides = array<i32>} : memref<2x8x16xf32, #tpu.memory_space<vmem>>, vector<1x8x16xf32>,
    %cst_12 = arith.constant dense<0.000000e+00> : vector<8xf32>
    %16 = vector.multi_reduction <add>, %12, %cst_12 [1] : vector<8x16xf32> to vector<8xf32>
    %17 = vector.shape_cast %16 : vector<8xf32> to vector<8x1xf32>
    %18 = arith.mulf %12, %12 : vector<8x16xf32>
    %cst_13 = arith.constant dense<0.000000e+00> : vector<8xf32>
    %19 = vector.multi_reduction <add>, %18, %cst_13 [1] : vector<8x16xf32> to vector<8xf32>
    %20 = vector.shape_cast %19 : vector<8xf32> to vector<8x1xf32>
    %21 = tpu.concatenate %17, %20 in 1 : vector<8x1xf32>, vector<8x1xf32> -> vector<8x2xf32>
    %22 = arith.addf %1, %21 : vector<8x2xf32>
    %cst_14 = arith.constant dense<0.000000e+00> : vector<8x16xf32>
    %23 = tpu.matmul %2, %5, %cst_14 {dimension_numbers = #tpu.dot_dimension_numbers<[1], [0], [0], [1], [0, 0, 1, 1], [], []>} : vector<8x4xf32>, vector<4x16xf32>, vector<8x16xf32> -> vector<8x16xf32>
    %cst_15 = arith.constant dense<0.000000e+00> : vector<8xf32>
    %24 = vector.multi_reduction <add>, %23, %cst_15 [1] : vector<8x16xf32> to vector<8xf32>
    %25 = vector.shape_cast %24 : vector<8xf32> to vector<8x1xf32>
    %26 = arith.mulf %23, %23 : vector<8x16xf32>
    %cst_16 = arith.constant dense<0.000000e+00> : vector<8xf32>
    %27 = vector.multi_reduction <add>, %26, %cst_16 [1] : vector<8x16xf32> to vector<8xf32>
    %28 = vector.shape_cast %27 : vector<8xf32> to vector<8x1xf32>
    %29 = tpu.concatenate %25, %28 in 1 : vector<8x1xf32>, vector<8x1xf32> -> vector<8x2xf32>
    %30 = arith.addf %3, %29 : vector<8x2xf32>
    %c1 = arith.constant 1 : index
    %c0_17 = arith.constant 0 : index
    %c0_18 = arith.constant 0 : index
    %31 = vector.load %arg1[%c1, %c0_17, %c0_18] : memref<2x4x16xf32, #tpu.memory_space<vmem>>, vector<1x4x16xf32>
    %32 = vector.shape_cast %31 : vector<1x4x16xf32> to vector<4x16xf32>
    %cst_19 = arith.constant 0.000000e+00 : f32
    %33 = vector.broadcast %cst_19 : f32 to vector<4x1xf32>
    %34 = vector.extract_strided_slice %32 {offsets = [0, 0], sizes = [4, 15], strides = [1, 1]} : vector<4x16xf32> to vector<4x15xf32>
    %35 = tpu.concatenate %33, %34 in 1 : vector<4x1xf32>, vector<4x15xf32> -> vector<4x16xf32>
    %36 = vector.extract_strided_slice %32 {offsets = [0, 1], sizes = [4, 15], strides = [1, 1]} : vector<4x16xf32> to vector<4x15xf32>
    %37 = tpu.concatenate %36, %33 in 1 : vector<4x15xf32>, vector<4x1xf32> -> vector<4x16xf32>
    %38 = tpu.concatenate %35, %32, %37 in 0 : vector<4x16xf32>, vector<4x16xf32>, vector<4x16xf32> -> vector<12x16xf32>
    %cst_20 = arith.constant dense<0.000000e+00> : vector<8x16xf32>
    %39 = tpu.matmul %0, %38, %cst_20 {dimension_numbers = #tpu.dot_dimension_numbers<[1], [0], [0], [1], [0, 0, 1, 1], [], []>} : vector<8x12xf32>, vector<12x16xf32>, vector<8x16xf32> -> vector<8x16xf32>
    %c1_21 = arith.constant 1 : index
    %c0_22 = arith.constant 0 : index
    %c0_23 = arith.constant 0 : index
    %40 = vector.load %arg4[%c1_21, %c0_22, %c0_23] : memref<2x8x16xf32, #tpu.memory_space<vmem>>, vector<1x8x16xf32>
    %41 = vector.shape_cast %40 : vector<1x8x16xf32> to vector<8x16xf32>
    %42 = vector.shape_cast %39 : vector<8x16xf32> to vector<1x8x16xf32>
    tpu.vector_store %arg4[%c1_21, %c0_22, %c0_23], %42 {strides = array<i32>} : memref<2x8x16xf32, #tpu.memory_space<vmem>>, vector<1x8x16xf32>,
    %cst_24 = arith.constant dense<0.000000e+00> : vector<8xf32>
    %43 = vector.multi_reduction <add>, %39, %cst_24 [1] : vector<8x16xf32> to vector<8xf32>
    %44 = vector.shape_cast %43 : vector<8xf32> to vector<8x1xf32>
    %45 = arith.mulf %39, %39 : vector<8x16xf32>
    %cst_25 = arith.constant dense<0.000000e+00> : vector<8xf32>
    %46 = vector.multi_reduction <add>, %45, %cst_25 [1] : vector<8x16xf32> to vector<8xf32>
    %47 = vector.shape_cast %46 : vector<8xf32> to vector<8x1xf32>
    %48 = tpu.concatenate %44, %47 in 1 : vector<8x1xf32>, vector<8x1xf32> -> vector<8x2xf32>
    %49 = arith.addf %22, %48 : vector<8x2xf32>
    %cst_26 = arith.constant dense<0.000000e+00> : vector<8x16xf32>
    %50 = tpu.matmul %2, %32, %cst_26 {dimension_numbers = #tpu.dot_dimension_numbers<[1], [0], [0], [1], [0, 0, 1, 1], [], []>} : vector<8x4xf32>, vector<4x16xf32>, vector<8x16xf32> -> vector<8x16xf32>
    %cst_27 = arith.constant dense<0.000000e+00> : vector<8xf32>
    %51 = vector.multi_reduction <add>, %50, %cst_27 [1] : vector<8x16xf32> to vector<8xf32>
    %52 = vector.shape_cast %51 : vector<8xf32> to vector<8x1xf32>
    %53 = arith.mulf %50, %50 : vector<8x16xf32>
    %cst_28 = arith.constant dense<0.000000e+00> : vector<8xf32>
    %54 = vector.multi_reduction <add>, %53, %cst_28 [1] : vector<8x16xf32> to vector<8xf32>
    %55 = vector.shape_cast %54 : vector<8xf32> to vector<8x1xf32>
    %56 = tpu.concatenate %52, %55 in 1 : vector<8x1xf32>, vector<8x1xf32> -> vector<8x2xf32>
    %57 = arith.addf %30, %56 : vector<8x2xf32>
    %c0_29 = arith.constant 0 : index
    %c0_30 = arith.constant 0 : index
    %c0_31 = arith.constant 0 : index
    %58 = vector.load %arg5[%c0_29, %c0_30, %c0_31] : memref<1x8x2xf32, #tpu.memory_space<vmem>>, vector<1x8x2xf32>
    %59 = vector.shape_cast %58 : vector<1x8x2xf32> to vector<8x2xf32>
    %60 = vector.shape_cast %49 : vector<8x2xf32> to vector<1x8x2xf32>
    tpu.vector_store %arg5[%c0_29, %c0_30, %c0_31], %60 {strides = array<i32>} : memref<1x8x2xf32, #tpu.memory_space<vmem>>, vector<1x8x2xf32>,
    %c0_32 = arith.constant 0 : index
    %c0_33 = arith.constant 0 : index
    %c0_34 = arith.constant 0 : index
    %61 = vector.load %arg6[%c0_32, %c0_33, %c0_34] : memref<1x8x2xf32, #tpu.memory_space<vmem>>, vector<1x8x2xf32>
    %62 = vector.shape_cast %61 : vector<1x8x2xf32> to vector<8x2xf32>
    %63 = vector.shape_cast %57 : vector<8x2xf32> to vector<1x8x2xf32>
    tpu.vector_store %arg6[%c0_32, %c0_33, %c0_34], %63 {strides = array<i32>} : memref<1x8x2xf32, #tpu.memory_space<vmem>>, vector<1x8x2xf32>,
    return
  }
  func.func @transform_0(%arg0: i32) -> (i32, i32, i32) {
    %c0_i32 = arith.constant 0 : i32
    %c0_i32_0 = arith.constant 0 : i32
    %c0_i32_1 = arith.constant 0 : i32
    return %arg0, %c0_i32, %c0_i32_0 : i32, i32, i32
  }
  func.func @transform_1(%arg0: i32) -> (i32, i32) {
    %c0_i32 = arith.constant 0 : i32
    %c0_i32_0 = arith.constant 0 : i32
    %c0_i32_1 = arith.constant 0 : i32
    return %c0_i32, %c0_i32_0 : i32, i32
  }
  func.func @transform_2(%arg0: i32) -> (i32, i32) {
    %c0_i32 = arith.constant 0 : i32
    %c0_i32_0 = arith.constant 0 : i32
    %c0_i32_1 = arith.constant 0 : i32
    return %c0_i32, %c0_i32_0 : i32, i32
  }
  func.func @transform_3(%arg0: i32) -> (i32, i32, i32) {
    %c0_i32 = arith.constant 0 : i32
    %c0_i32_0 = arith.constant 0 : i32
    %c0_i32_1 = arith.constant 0 : i32
    return %arg0, %c0_i32, %c0_i32_0 : i32, i32, i32
  }
  func.func @transform_4(%arg0: i32) -> (i32, i32, i32) {
    %c0_i32 = arith.constant 0 : i32
    %c0_i32_0 = arith.constant 0 : i32
    %c0_i32_1 = arith.constant 0 : i32
    return %arg0, %c0_i32, %c0_i32_0 : i32, i32, i32
  }
  func.func @transform_5(%arg0: i32) -> (i32, i32, i32) {
    %c0_i32 = arith.constant 0 : i32
    %c0_i32_0 = arith.constant 0 : i32
    %c0_i32_1 = arith.constant 0 : i32
    return %arg0, %c0_i32, %c0_i32_0 : i32, i32, i32
  }
}

module attributes {stable_mosaic.version = 11 : i64} {
  func.func @kernel(%arg0: i32, %arg1: memref<2x8x16xf32, #tpu.memory_space<vmem>>, %arg2: memref<8x1xf32, #tpu.memory_space<vmem>>, %arg3: memref<8x1xf32, #tpu.memory_space<vmem>>, %arg4: memref<8x24xf32, #tpu.memory_space<vmem>>, %arg5: memref<1x8x2xf32, #tpu.memory_space<vmem>>) attributes {dimension_semantics = [#tpu.dimension_semantics<parallel>], iteration_bounds = array<i64: 1>, scalar_prefetch = 0 : i64, scratch_operands = 0 : i64, tpu.core_type = #tpu.core_type<tc>, window_params = [{transform_indices = @transform_0, window_bounds = array<i64: 2, 8, 16>}, {pipeline_mode = #tpu.pipeline_mode<synchronous>, transform_indices = @transform_1, window_bounds = array<i64: 8, 1>}, {pipeline_mode = #tpu.pipeline_mode<synchronous>, transform_indices = @transform_2, window_bounds = array<i64: 8, 1>}, {pipeline_mode = #tpu.pipeline_mode<synchronous>, transform_indices = @transform_3, window_bounds = array<i64: 8, 24>}, {transform_indices = @transform_4, window_bounds = array<i64: 1, 8, 2>}]} {
    %c0 = arith.constant 0 : index
    %c0_0 = arith.constant 0 : index
    %0 = vector.load %arg4[%c0, %c0_0] : memref<8x24xf32, #tpu.memory_space<vmem>>, vector<8x24xf32>
    %c0_1 = arith.constant 0 : index
    %c0_2 = arith.constant 0 : index
    %1 = vector.load %arg2[%c0_1, %c0_2] : memref<8x1xf32, #tpu.memory_space<vmem>>, vector<8x1xf32>
    %c0_3 = arith.constant 0 : index
    %c0_4 = arith.constant 0 : index
    %2 = vector.load %arg3[%c0_3, %c0_4] : memref<8x1xf32, #tpu.memory_space<vmem>>, vector<8x1xf32>
    %cst = arith.constant 0.000000e+00 : f32
    %3 = vector.broadcast %cst : f32 to vector<8x2xf32>
    %c0_5 = arith.constant 0 : index
    %c0_6 = arith.constant 0 : index
    %c0_7 = arith.constant 0 : index
    %4 = vector.load %arg1[%c0_5, %c0_6, %c0_7] : memref<2x8x16xf32, #tpu.memory_space<vmem>>, vector<1x8x16xf32>
    %5 = vector.shape_cast %4 : vector<1x8x16xf32> to vector<8x16xf32>
    %6 = vector.broadcast %1 : vector<8x1xf32> to vector<8x16xf32>
    %7 = arith.mulf %5, %6 : vector<8x16xf32>
    %8 = vector.broadcast %2 : vector<8x1xf32> to vector<8x16xf32>
    %9 = arith.addf %7, %8 : vector<8x16xf32>
    %cst_8 = arith.constant 0.000000e+00 : f32
    %10 = vector.broadcast %cst_8 : f32 to vector<8x16xf32>
    %11 = arith.maximumf %9, %10 : vector<8x16xf32>
    %cst_9 = arith.constant 0.000000e+00 : f32
    %12 = vector.broadcast %cst_9 : f32 to vector<8x1xf32>
    %13 = vector.extract_strided_slice %11 {offsets = [0, 0], sizes = [8, 15], strides = [1, 1]} : vector<8x16xf32> to vector<8x15xf32>
    %14 = tpu.concatenate %12, %13 in 1 : vector<8x1xf32>, vector<8x15xf32> -> vector<8x16xf32>
    %15 = vector.extract_strided_slice %11 {offsets = [0, 1], sizes = [8, 15], strides = [1, 1]} : vector<8x16xf32> to vector<8x15xf32>
    %16 = tpu.concatenate %15, %12 in 1 : vector<8x15xf32>, vector<8x1xf32> -> vector<8x16xf32>
    %17 = tpu.concatenate %14, %11, %16 in 0 : vector<8x16xf32>, vector<8x16xf32>, vector<8x16xf32> -> vector<24x16xf32>
    %cst_10 = arith.constant dense<0.000000e+00> : vector<8x16xf32>
    %18 = tpu.matmul %0, %17, %cst_10 {dimension_numbers = #tpu.dot_dimension_numbers<[1], [0], [0], [1], [0, 0, 1, 1], [], []>} : vector<8x24xf32>, vector<24x16xf32>, vector<8x16xf32> -> vector<8x16xf32>
    %cst_11 = arith.constant dense<0.000000e+00> : vector<8xf32>
    %19 = vector.multi_reduction <add>, %18, %cst_11 [1] : vector<8x16xf32> to vector<8xf32>
    %20 = vector.shape_cast %19 : vector<8xf32> to vector<8x1xf32>
    %21 = arith.mulf %18, %18 : vector<8x16xf32>
    %cst_12 = arith.constant dense<0.000000e+00> : vector<8xf32>
    %22 = vector.multi_reduction <add>, %21, %cst_12 [1] : vector<8x16xf32> to vector<8xf32>
    %23 = vector.shape_cast %22 : vector<8xf32> to vector<8x1xf32>
    %24 = tpu.concatenate %20, %23 in 1 : vector<8x1xf32>, vector<8x1xf32> -> vector<8x2xf32>
    %25 = arith.addf %3, %24 : vector<8x2xf32>
    %c1 = arith.constant 1 : index
    %c0_13 = arith.constant 0 : index
    %c0_14 = arith.constant 0 : index
    %26 = vector.load %arg1[%c1, %c0_13, %c0_14] : memref<2x8x16xf32, #tpu.memory_space<vmem>>, vector<1x8x16xf32>
    %27 = vector.shape_cast %26 : vector<1x8x16xf32> to vector<8x16xf32>
    %28 = vector.broadcast %1 : vector<8x1xf32> to vector<8x16xf32>
    %29 = arith.mulf %27, %28 : vector<8x16xf32>
    %30 = vector.broadcast %2 : vector<8x1xf32> to vector<8x16xf32>
    %31 = arith.addf %29, %30 : vector<8x16xf32>
    %cst_15 = arith.constant 0.000000e+00 : f32
    %32 = vector.broadcast %cst_15 : f32 to vector<8x16xf32>
    %33 = arith.maximumf %31, %32 : vector<8x16xf32>
    %cst_16 = arith.constant 0.000000e+00 : f32
    %34 = vector.broadcast %cst_16 : f32 to vector<8x1xf32>
    %35 = vector.extract_strided_slice %33 {offsets = [0, 0], sizes = [8, 15], strides = [1, 1]} : vector<8x16xf32> to vector<8x15xf32>
    %36 = tpu.concatenate %34, %35 in 1 : vector<8x1xf32>, vector<8x15xf32> -> vector<8x16xf32>
    %37 = vector.extract_strided_slice %33 {offsets = [0, 1], sizes = [8, 15], strides = [1, 1]} : vector<8x16xf32> to vector<8x15xf32>
    %38 = tpu.concatenate %37, %34 in 1 : vector<8x15xf32>, vector<8x1xf32> -> vector<8x16xf32>
    %39 = tpu.concatenate %36, %33, %38 in 0 : vector<8x16xf32>, vector<8x16xf32>, vector<8x16xf32> -> vector<24x16xf32>
    %cst_17 = arith.constant dense<0.000000e+00> : vector<8x16xf32>
    %40 = tpu.matmul %0, %39, %cst_17 {dimension_numbers = #tpu.dot_dimension_numbers<[1], [0], [0], [1], [0, 0, 1, 1], [], []>} : vector<8x24xf32>, vector<24x16xf32>, vector<8x16xf32> -> vector<8x16xf32>
    %cst_18 = arith.constant dense<0.000000e+00> : vector<8xf32>
    %41 = vector.multi_reduction <add>, %40, %cst_18 [1] : vector<8x16xf32> to vector<8xf32>
    %42 = vector.shape_cast %41 : vector<8xf32> to vector<8x1xf32>
    %43 = arith.mulf %40, %40 : vector<8x16xf32>
    %cst_19 = arith.constant dense<0.000000e+00> : vector<8xf32>
    %44 = vector.multi_reduction <add>, %43, %cst_19 [1] : vector<8x16xf32> to vector<8xf32>
    %45 = vector.shape_cast %44 : vector<8xf32> to vector<8x1xf32>
    %46 = tpu.concatenate %42, %45 in 1 : vector<8x1xf32>, vector<8x1xf32> -> vector<8x2xf32>
    %47 = arith.addf %25, %46 : vector<8x2xf32>
    %c0_20 = arith.constant 0 : index
    %c0_21 = arith.constant 0 : index
    %c0_22 = arith.constant 0 : index
    %48 = vector.load %arg5[%c0_20, %c0_21, %c0_22] : memref<1x8x2xf32, #tpu.memory_space<vmem>>, vector<1x8x2xf32>
    %49 = vector.shape_cast %48 : vector<1x8x2xf32> to vector<8x2xf32>
    %50 = vector.shape_cast %47 : vector<8x2xf32> to vector<1x8x2xf32>
    tpu.vector_store %arg5[%c0_20, %c0_21, %c0_22], %50 {strides = array<i32>} : memref<1x8x2xf32, #tpu.memory_space<vmem>>, vector<1x8x2xf32>,
    return
  }
  func.func @transform_0(%arg0: i32) -> (i32, i32, i32) {
    %c0_i32 = arith.constant 0 : i32
    %c0_i32_0 = arith.constant 0 : i32
    %c0_i32_1 = arith.constant 0 : i32
    return %arg0, %c0_i32, %c0_i32_0 : i32, i32, i32
  }
  func.func @transform_1(%arg0: i32) -> (i32, i32) {
    %c0_i32 = arith.constant 0 : i32
    %c0_i32_0 = arith.constant 0 : i32
    %c0_i32_1 = arith.constant 0 : i32
    return %c0_i32, %c0_i32_0 : i32, i32
  }
  func.func @transform_2(%arg0: i32) -> (i32, i32) {
    %c0_i32 = arith.constant 0 : i32
    %c0_i32_0 = arith.constant 0 : i32
    %c0_i32_1 = arith.constant 0 : i32
    return %c0_i32, %c0_i32_0 : i32, i32
  }
  func.func @transform_3(%arg0: i32) -> (i32, i32) {
    %c0_i32 = arith.constant 0 : i32
    %c0_i32_0 = arith.constant 0 : i32
    %c0_i32_1 = arith.constant 0 : i32
    return %c0_i32, %c0_i32_0 : i32, i32
  }
  func.func @transform_4(%arg0: i32) -> (i32, i32, i32) {
    %c0_i32 = arith.constant 0 : i32
    %c0_i32_0 = arith.constant 0 : i32
    %c0_i32_1 = arith.constant 0 : i32
    return %arg0, %c0_i32, %c0_i32_0 : i32, i32, i32
  }
}

module attributes {stable_mosaic.version = 11 : i64} {
  func.func @kernel(%arg0: i32, %arg1: memref<2x8x16xf32, #tpu.memory_space<vmem>>, %arg2: memref<2x4x16xf32, #tpu.memory_space<vmem>>, %arg3: memref<8x1xf32, #tpu.memory_space<vmem>>, %arg4: memref<8x1xf32, #tpu.memory_space<vmem>>, %arg5: memref<8x24xf32, #tpu.memory_space<vmem>>, %arg6: memref<8x1xf32, #tpu.memory_space<vmem>>, %arg7: memref<8x1xf32, #tpu.memory_space<vmem>>, %arg8: memref<8x4xf32, #tpu.memory_space<vmem>>, %arg9: memref<8x1xf32, #tpu.memory_space<vmem>>, %arg10: memref<8x1xf32, #tpu.memory_space<vmem>>, %arg11: memref<2x8x16xf32, #tpu.memory_space<vmem>>) attributes {dimension_semantics = [#tpu.dimension_semantics<parallel>], iteration_bounds = array<i64: 1>, scalar_prefetch = 0 : i64, scratch_operands = 0 : i64, tpu.core_type = #tpu.core_type<tc>, window_params = [{transform_indices = @transform_0, window_bounds = array<i64: 2, 8, 16>}, {transform_indices = @transform_1, window_bounds = array<i64: 2, 4, 16>}, {pipeline_mode = #tpu.pipeline_mode<synchronous>, transform_indices = @transform_2, window_bounds = array<i64: 8, 1>}, {pipeline_mode = #tpu.pipeline_mode<synchronous>, transform_indices = @transform_3, window_bounds = array<i64: 8, 1>}, {pipeline_mode = #tpu.pipeline_mode<synchronous>, transform_indices = @transform_4, window_bounds = array<i64: 8, 24>}, {pipeline_mode = #tpu.pipeline_mode<synchronous>, transform_indices = @transform_5, window_bounds = array<i64: 8, 1>}, {pipeline_mode = #tpu.pipeline_mode<synchronous>, transform_indices = @transform_6, window_bounds = array<i64: 8, 1>}, {pipeline_mode = #tpu.pipeline_mode<synchronous>, transform_indices = @transform_7, window_bounds = array<i64: 8, 4>}, {pipeline_mode = #tpu.pipeline_mode<synchronous>, transform_indices = @transform_8, window_bounds = array<i64: 8, 1>}, {pipeline_mode = #tpu.pipeline_mode<synchronous>, transform_indices = @transform_9, window_bounds = array<i64: 8, 1>}, {transform_indices = @transform_10, window_bounds = array<i64: 2, 8, 16>}]} {
    %c0 = arith.constant 0 : index
    %c0_0 = arith.constant 0 : index
    %0 = vector.load %arg5[%c0, %c0_0] : memref<8x24xf32, #tpu.memory_space<vmem>>, vector<8x24xf32>
    %c0_1 = arith.constant 0 : index
    %c0_2 = arith.constant 0 : index
    %1 = vector.load %arg3[%c0_1, %c0_2] : memref<8x1xf32, #tpu.memory_space<vmem>>, vector<8x1xf32>
    %c0_3 = arith.constant 0 : index
    %c0_4 = arith.constant 0 : index
    %2 = vector.load %arg4[%c0_3, %c0_4] : memref<8x1xf32, #tpu.memory_space<vmem>>, vector<8x1xf32>
    %c0_5 = arith.constant 0 : index
    %c0_6 = arith.constant 0 : index
    %3 = vector.load %arg6[%c0_5, %c0_6] : memref<8x1xf32, #tpu.memory_space<vmem>>, vector<8x1xf32>
    %c0_7 = arith.constant 0 : index
    %c0_8 = arith.constant 0 : index
    %4 = vector.load %arg7[%c0_7, %c0_8] : memref<8x1xf32, #tpu.memory_space<vmem>>, vector<8x1xf32>
    %c0_9 = arith.constant 0 : index
    %c0_10 = arith.constant 0 : index
    %5 = vector.load %arg8[%c0_9, %c0_10] : memref<8x4xf32, #tpu.memory_space<vmem>>, vector<8x4xf32>
    %c0_11 = arith.constant 0 : index
    %c0_12 = arith.constant 0 : index
    %6 = vector.load %arg9[%c0_11, %c0_12] : memref<8x1xf32, #tpu.memory_space<vmem>>, vector<8x1xf32>
    %c0_13 = arith.constant 0 : index
    %c0_14 = arith.constant 0 : index
    %7 = vector.load %arg10[%c0_13, %c0_14] : memref<8x1xf32, #tpu.memory_space<vmem>>, vector<8x1xf32>
    %c0_15 = arith.constant 0 : index
    %c0_16 = arith.constant 0 : index
    %c0_17 = arith.constant 0 : index
    %8 = vector.load %arg1[%c0_15, %c0_16, %c0_17] : memref<2x8x16xf32, #tpu.memory_space<vmem>>, vector<1x8x16xf32>
    %9 = vector.shape_cast %8 : vector<1x8x16xf32> to vector<8x16xf32>
    %10 = vector.broadcast %1 : vector<8x1xf32> to vector<8x16xf32>
    %11 = arith.mulf %9, %10 : vector<8x16xf32>
    %12 = vector.broadcast %2 : vector<8x1xf32> to vector<8x16xf32>
    %13 = arith.addf %11, %12 : vector<8x16xf32>
    %cst = arith.constant 0.000000e+00 : f32
    %14 = vector.broadcast %cst : f32 to vector<8x16xf32>
    %15 = arith.maximumf %13, %14 : vector<8x16xf32>
    %cst_18 = arith.constant 0.000000e+00 : f32
    %16 = vector.broadcast %cst_18 : f32 to vector<8x1xf32>
    %17 = vector.extract_strided_slice %15 {offsets = [0, 0], sizes = [8, 15], strides = [1, 1]} : vector<8x16xf32> to vector<8x15xf32>
    %18 = tpu.concatenate %16, %17 in 1 : vector<8x1xf32>, vector<8x15xf32> -> vector<8x16xf32>
    %19 = vector.extract_strided_slice %15 {offsets = [0, 1], sizes = [8, 15], strides = [1, 1]} : vector<8x16xf32> to vector<8x15xf32>
    %20 = tpu.concatenate %19, %16 in 1 : vector<8x15xf32>, vector<8x1xf32> -> vector<8x16xf32>
    %21 = tpu.concatenate %18, %15, %20 in 0 : vector<8x16xf32>, vector<8x16xf32>, vector<8x16xf32> -> vector<24x16xf32>
    %cst_19 = arith.constant dense<0.000000e+00> : vector<8x16xf32>
    %22 = tpu.matmul %0, %21, %cst_19 {dimension_numbers = #tpu.dot_dimension_numbers<[1], [0], [0], [1], [0, 0, 1, 1], [], []>} : vector<8x24xf32>, vector<24x16xf32>, vector<8x16xf32> -> vector<8x16xf32>
    %23 = vector.broadcast %3 : vector<8x1xf32> to vector<8x16xf32>
    %24 = arith.mulf %22, %23 : vector<8x16xf32>
    %25 = vector.broadcast %4 : vector<8x1xf32> to vector<8x16xf32>
    %26 = arith.addf %24, %25 : vector<8x16xf32>
    %c0_20 = arith.constant 0 : index
    %c0_21 = arith.constant 0 : index
    %c0_22 = arith.constant 0 : index
    %27 = vector.load %arg2[%c0_20, %c0_21, %c0_22] : memref<2x4x16xf32, #tpu.memory_space<vmem>>, vector<1x4x16xf32>
    %28 = vector.shape_cast %27 : vector<1x4x16xf32> to vector<4x16xf32>
    %cst_23 = arith.constant dense<0.000000e+00> : vector<8x16xf32>
    %29 = tpu.matmul %5, %28, %cst_23 {dimension_numbers = #tpu.dot_dimension_numbers<[1], [0], [0], [1], [0, 0, 1, 1], [], []>} : vector<8x4xf32>, vector<4x16xf32>, vector<8x16xf32> -> vector<8x16xf32>
    %30 = vector.broadcast %6 : vector<8x1xf32> to vector<8x16xf32>
    %31 = arith.mulf %29, %30 : vector<8x16xf32>
    %32 = vector.broadcast %7 : vector<8x1xf32> to vector<8x16xf32>
    %33 = arith.addf %31, %32 : vector<8x16xf32>
    %34 = arith.addf %26, %33 : vector<8x16xf32>
    %cst_24 = arith.constant 0.000000e+00 : f32
    %35 = vector.broadcast %cst_24 : f32 to vector<8x16xf32>
    %36 = arith.maximumf %34, %35 : vector<8x16xf32>
    %c0_25 = arith.constant 0 : index
    %c0_26 = arith.constant 0 : index
    %c0_27 = arith.constant 0 : index
    %37 = vector.load %arg11[%c0_25, %c0_26, %c0_27] : memref<2x8x16xf32, #tpu.memory_space<vmem>>, vector<1x8x16xf32>
    %38 = vector.shape_cast %37 : vector<1x8x16xf32> to vector<8x16xf32>
    %39 = vector.shape_cast %36 : vector<8x16xf32> to vector<1x8x16xf32>
    tpu.vector_store %arg11[%c0_25, %c0_26, %c0_27], %39 {strides = array<i32>} : memref<2x8x16xf32, #tpu.memory_space<vmem>>, vector<1x8x16xf32>,
    %c1 = arith.constant 1 : index
    %c0_28 = arith.constant 0 : index
    %c0_29 = arith.constant 0 : index
    %40 = vector.load %arg1[%c1, %c0_28, %c0_29] : memref<2x8x16xf32, #tpu.memory_space<vmem>>, vector<1x8x16xf32>
    %41 = vector.shape_cast %40 : vector<1x8x16xf32> to vector<8x16xf32>
    %42 = vector.broadcast %1 : vector<8x1xf32> to vector<8x16xf32>
    %43 = arith.mulf %41, %42 : vector<8x16xf32>
    %44 = vector.broadcast %2 : vector<8x1xf32> to vector<8x16xf32>
    %45 = arith.addf %43, %44 : vector<8x16xf32>
    %cst_30 = arith.constant 0.000000e+00 : f32
    %46 = vector.broadcast %cst_30 : f32 to vector<8x16xf32>
    %47 = arith.maximumf %45, %46 : vector<8x16xf32>
    %cst_31 = arith.constant 0.000000e+00 : f32
    %48 = vector.broadcast %cst_31 : f32 to vector<8x1xf32>
    %49 = vector.extract_strided_slice %47 {offsets = [0, 0], sizes = [8, 15], strides = [1, 1]} : vector<8x16xf32> to vector<8x15xf32>
    %50 = tpu.concatenate %48, %49 in 1 : vector<8x1xf32>, vector<8x15xf32> -> vector<8x16xf32>
    %51 = vector.extract_strided_slice %47 {offsets = [0, 1], sizes = [8, 15], strides = [1, 1]} : vector<8x16xf32> to vector<8x15xf32>
    %52 = tpu.concatenate %51, %48 in 1 : vector<8x15xf32>, vector<8x1xf32> -> vector<8x16xf32>
    %53 = tpu.concatenate %50, %47, %52 in 0 : vector<8x16xf32>, vector<8x16xf32>, vector<8x16xf32> -> vector<24x16xf32>
    %cst_32 = arith.constant dense<0.000000e+00> : vector<8x16xf32>
    %54 = tpu.matmul %0, %53, %cst_32 {dimension_numbers = #tpu.dot_dimension_numbers<[1], [0], [0], [1], [0, 0, 1, 1], [], []>} : vector<8x24xf32>, vector<24x16xf32>, vector<8x16xf32> -> vector<8x16xf32>
    %55 = vector.broadcast %3 : vector<8x1xf32> to vector<8x16xf32>
    %56 = arith.mulf %54, %55 : vector<8x16xf32>
    %57 = vector.broadcast %4 : vector<8x1xf32> to vector<8x16xf32>
    %58 = arith.addf %56, %57 : vector<8x16xf32>
    %c1_33 = arith.constant 1 : index
    %c0_34 = arith.constant 0 : index
    %c0_35 = arith.constant 0 : index
    %59 = vector.load %arg2[%c1_33, %c0_34, %c0_35] : memref<2x4x16xf32, #tpu.memory_space<vmem>>, vector<1x4x16xf32>
    %60 = vector.shape_cast %59 : vector<1x4x16xf32> to vector<4x16xf32>
    %cst_36 = arith.constant dense<0.000000e+00> : vector<8x16xf32>
    %61 = tpu.matmul %5, %60, %cst_36 {dimension_numbers = #tpu.dot_dimension_numbers<[1], [0], [0], [1], [0, 0, 1, 1], [], []>} : vector<8x4xf32>, vector<4x16xf32>, vector<8x16xf32> -> vector<8x16xf32>
    %62 = vector.broadcast %6 : vector<8x1xf32> to vector<8x16xf32>
    %63 = arith.mulf %61, %62 : vector<8x16xf32>
    %64 = vector.broadcast %7 : vector<8x1xf32> to vector<8x16xf32>
    %65 = arith.addf %63, %64 : vector<8x16xf32>
    %66 = arith.addf %58, %65 : vector<8x16xf32>
    %cst_37 = arith.constant 0.000000e+00 : f32
    %67 = vector.broadcast %cst_37 : f32 to vector<8x16xf32>
    %68 = arith.maximumf %66, %67 : vector<8x16xf32>
    %c1_38 = arith.constant 1 : index
    %c0_39 = arith.constant 0 : index
    %c0_40 = arith.constant 0 : index
    %69 = vector.load %arg11[%c1_38, %c0_39, %c0_40] : memref<2x8x16xf32, #tpu.memory_space<vmem>>, vector<1x8x16xf32>
    %70 = vector.shape_cast %69 : vector<1x8x16xf32> to vector<8x16xf32>
    %71 = vector.shape_cast %68 : vector<8x16xf32> to vector<1x8x16xf32>
    tpu.vector_store %arg11[%c1_38, %c0_39, %c0_40], %71 {strides = array<i32>} : memref<2x8x16xf32, #tpu.memory_space<vmem>>, vector<1x8x16xf32>,
    return
  }
  func.func @transform_0(%arg0: i32) -> (i32, i32, i32) {
    %c0_i32 = arith.constant 0 : i32
    %c0_i32_0 = arith.constant 0 : i32
    %c0_i32_1 = arith.constant 0 : i32
    return %arg0, %c0_i32, %c0_i32_0 : i32, i32, i32
  }
  func.func @transform_1(%arg0: i32) -> (i32, i32, i32) {
    %c0_i32 = arith.constant 0 : i32
    %c0_i32_0 = arith.constant 0 : i32
    %c0_i32_1 = arith.constant 0 : i32
    return %arg0, %c0_i32, %c0_i32_0 : i32, i32, i32
  }
  func.func @transform_2(%arg0: i32) -> (i32, i32) {
    %c0_i32 = arith.constant 0 : i32
    %c0_i32_0 = arith.constant 0 : i32
    %c0_i32_1 = arith.constant 0 : i32
    return %c0_i32, %c0_i32_0 : i32, i32
  }
  func.func @transform_3(%arg0: i32) -> (i32, i32) {
    %c0_i32 = arith.constant 0 : i32
    %c0_i32_0 = arith.constant 0 : i32
    %c0_i32_1 = arith.constant 0 : i32
    return %c0_i32, %c0_i32_0 : i32, i32
  }
  func.func @transform_4(%arg0: i32) -> (i32, i32) {
    %c0_i32 = arith.constant 0 : i32
    %c0_i32_0 = arith.constant 0 : i32
    %c0_i32_1 = arith.constant 0 : i32
    return %c0_i32, %c0_i32_0 : i32, i32
  }
  func.func @transform_5(%arg0: i32) -> (i32, i32) {
    %c0_i32 = arith.constant 0 : i32
    %c0_i32_0 = arith.constant 0 : i32
    %c0_i32_1 = arith.constant 0 : i32
    return %c0_i32, %c0_i32_0 : i32, i32
  }
  func.func @transform_6(%arg0: i32) -> (i32, i32) {
    %c0_i32 = arith.constant 0 : i32
    %c0_i32_0 = arith.constant 0 : i32
    %c0_i32_1 = arith.constant 0 : i32
    return %c0_i32, %c0_i32_0 : i32, i32
  }
  func.func @transform_7(%arg0: i32) -> (i32, i32) {
    %c0_i32 = arith.constant 0 : i32
    %c0_i32_0 = arith.constant 0 : i32
    %c0_i32_1 = arith.constant 0 : i32
    return %c0_i32, %c0_i32_0 : i32, i32
  }
  func.func @transform_8(%arg0: i32) -> (i32, i32) {
    %c0_i32 = arith.constant 0 : i32
    %c0_i32_0 = arith.constant 0 : i32
    %c0_i32_1 = arith.constant 0 : i32
    return %c0_i32, %c0_i32_0 : i32, i32
  }
  func.func @transform_9(%arg0: i32) -> (i32, i32) {
    %c0_i32 = arith.constant 0 : i32
    %c0_i32_0 = arith.constant 0 : i32
    %c0_i32_1 = arith.constant 0 : i32
    return %c0_i32, %c0_i32_0 : i32, i32
  }
  func.func @transform_10(%arg0: i32) -> (i32, i32, i32) {
    %c0_i32 = arith.constant 0 : i32
    %c0_i32_0 = arith.constant 0 : i32
    %c0_i32_1 = arith.constant 0 : i32
    return %arg0, %c0_i32, %c0_i32_0 : i32, i32, i32
  }
}

</mosaic_0001>

<bundles_post_ra>
// kernel: residual_block_1d.3
= control target key start
LH: loop header
LB: loop body
LE: loop exit
PB: predicated region body
PF: predicated region fallthrough
CT: control target
= control target key end

     0   :  { %vm33_vm0 = vcmask 1043456   ;;  %vm73_vm1 = vcmask 31744   ;;  %s214_s24 = smov 127   ;;  %s215_s25 = smov 1   ;;  %vm29_vm2 = vcmask 121856   ;;  %vm24_vm3 = vcmask 7168   ;;  %s292_s0 = inlined_call_operand.vmem [shape: f32[2,4,16], index: 0, kind: input, shape index: {}]   ;;  %s293_s2 = inlined_call_operand.vmem [shape: f32[8,4], index: 2, kind: input, shape index: {}]   ;;  %s294_s1 = inlined_call_operand.vmem [shape: f32[8,12], index: 1, kind: input, shape index: {}]   ;;  %s295_s3 = inlined_call_operand.vmem [shape: f32[2,8,16], index: 3, kind: output, shape index: {0}]   ;;  %s296_s4 = inlined_call_operand.vmem [shape: f32[1,8,2], index: 4, kind: output, shape index: {1}]   ;;  %s297_s5 = inlined_call_operand.vmem [shape: f32[1,8,2], index: 5, kind: output, shape index: {2}]  }
   0x1   :  { %v19_v0 = vld [vmem:[%s292_s0] sm:$0xf]  ;;  %v206_v1 = vld [vmem:[%s292_s0 + $0x4] sm:$0xf]  ;;  %vm35_vm4 = vcmask 97280   ;;  %vm62_vm5 = vcmask 130048  }
   0x2   :  { %v18_v2 = vld [vmem:[%s293_s2] sm:$0xff]  ;;  %26 = vrot.lane.b32.xlu1 %v19_v0, %s214_s24  ;;  %115 = vrot.lane.b32.xlu0 %v206_v1, %s214_s24  ;;  %v31_v7 = vrot.slane %v19_v0, 4  ;;  %v119_v8 = vrot.slane %v206_v1, 4  ;;  %vm187_vm6 = vcmask 15360  }
   0x3   :  { %210 = vmatpush.msk.msra.mxu3 %vm33_vm0, %v206_v1  ;;  %204 = vmatpush.msk.msra.mxu1 %vm33_vm0, %v19_v0  ;;  %v17_v12 = vld [vmem:[%s294_s1] sm:$0xff] }
   0x4   :  { %211 = vmatmul.msk.f32.vlgmr.msra.gmra.mxu3 %vm73_vm1, %v18_v2  ;;  %205 = vmatmul.msk.f32.vlgmr.msra.gmra.mxu1 %vm73_vm1, %v18_v2 }
   0xa   :  { %21 = vrot.lane.b32.xlu1 %v19_v0, %s215_s25  ;;  %111 = vrot.lane.b32.xlu0 %v206_v1, %s215_s25 }
  0x74   :  { %v27_v3 = vpop.permute.xlu1 %26  ;;  %v116_v4 = vpop.permute.xlu0 %115 }
  0x75   :  { %v30_v5 = vsel %vm29_vm2, %v27_v3, 0.0  ;;  %v118_v6 = vsel %vm29_vm2, %v116_v4, 0.0 }
  0x76   :  { %202 = vmatpush.msk.msra.mxu0 %vm33_vm0, %v30_v5  ;;  %207 = vmatpush.msk.msra.mxu2 %vm33_vm0, %v118_v6 }
  0x7c   :  { %v22_v9 = vpop.permute.xlu1 %21  ;;  %v112_v10 = vpop.permute.xlu0 %111 }
  0x7d   :  { %v25_v11 = vsel %vm24_vm3, 0.0, %v22_v9  ;;  %v114_v13 = vsel %vm24_vm3, 0.0, %v112_v10 }
  0x7e   :  { %v34_v14 = vsel %vm33_vm0, %v25_v11, %v31_v7  ;;  %v121_v15 = vsel %vm33_vm0, %v114_v13, %v119_v8 }
  0x7f   :  { %57 = vmatpush.msra.mxu0 %v34_v14  ;;  %140 = vmatpush.msra.mxu2 %v121_v15 }
  0x80   :  { %203 = vmatmul.msk.f32.vlgmr.msra.gmra.mxu0 %vm35_vm4, %v17_v12  ;;  %208 = vmatmul.msk.f32.vlgmr.msra.gmra.mxu2 %vm35_vm4, %v17_v12 }
  0x81   :  { %v96_v18 = vpop.f32.mrf.mxu1 }
  0x82   :  { %v102_v19 = vmul.f32 %v96_v18, %v96_v18  ;;  %v99_v20 = vsel %vm62_vm5, %v96_v18, 0.0 }
  0x83   :  { %100 = vadd.xlane.f32.xlu0 %v99_v20 }
  0x84   :  { %v103_v21 = vsel %vm62_vm5, %v102_v19, 0.0 }
  0x85   :  { %104 = vadd.xlane.f32.xlu1 %v103_v21 }
  0x87   :  { %v175_v16 = vpop.f32.mrf.mxu3 }
  0x88   :  { %v178_v17 = vsel %vm62_vm5, %v175_v16, 0.0  ;;  %v181_v30 = vmul.f32 %v175_v16, %v175_v16 }
  0x89   :  { %179 = vadd.xlane.f32.xlu2 %v178_v17 }
  0x8a   :  { %v182_v31 = vsel %vm62_vm5, %v181_v30, 0.0 }
  0xf6   :  { %v101_v41 = vpop.xlane.xlu0 %100 }
  0xf8   :  { %v105_v40 = vpop.xlane.xlu1 %104 }
  0xf9   :  { %v106_v43 = vsel %vm24_vm3, %v101_v41, %v105_v40 }
  0xfc   :  { %v180_v32 = vpop.xlane.xlu2 %179 }
  0xfd   :  { %v59_v22 = vpop.f32.mrf.mxu0 }
  0xfe   :  { %63 = vst.msk [vmem:[%s295_s3] sm:$0xff] %vm62_vm5, %v59_v22  ;;  %v64_v23 = vsel %vm62_vm5, %v59_v22, 0.0  ;;  %v67_v24 = vmul.f32 %v59_v22, %v59_v22 }
  0xff   :  { %65 = vadd.xlane.f32.xlu2 %v64_v23 }
 0x100   :  { %v68_v26 = vsel %vm62_vm5, %v67_v24, 0.0 }
 0x103   :  { %v142_v25 = vpop.f32.mrf.mxu2 }
 0x104   :  { %209 = vst.msk [vmem:[%s295_s3 + $0x8] sm:$0xff] %vm62_vm5, %v142_v25  ;;  %v147_v27 = vsel %vm62_vm5, %v142_v25, 0.0  ;;  %v150_v28 = vmul.f32 %v142_v25, %v142_v25 }
 0x106   :  { %v151_v29 = vsel %vm62_vm5, %v150_v28, 0.0 }
 0x107   :  { %69 = vadd.xlane.f32.xlu2 %v68_v26 }
 0x10f   :  { %148 = vadd.xlane.f32.xlu2 %v147_v27 }
 0x117   :  { %152 = vadd.xlane.f32.xlu2 %v151_v29 }
 0x11f   :  { %183 = vadd.xlane.f32.xlu2 %v182_v31 }
 0x172   :  { %v66_v33 = vpop.xlane.xlu2 %65 }
 0x17a   :  { %v70_v34 = vpop.xlane.xlu2 %69 }
 0x17b   :  { %v71_v37 = vsel %vm24_vm3, %v66_v33, %v70_v34 }
 0x182   :  { %v149_v35 = vpop.xlane.xlu2 %148 }
 0x18a   :  { %v153_v36 = vpop.xlane.xlu2 %152 }
 0x18b   :  { %v154_v38 = vsel %vm24_vm3, %v149_v35, %v153_v36 }
 0x18c   :  { %v155_v39 = vadd.f32 %v154_v38, %v71_v37 }
 0x18e   :  { %188 = vst.msk [vmem:[%s296_s4] sm:$0xff] %vm187_vm6, %v155_v39 }
 0x192   :  { %v184_v42 = vpop.xlane.xlu2 %183 }
 0x193   :  { %v185_v44 = vsel %vm24_vm3, %v180_v32, %v184_v42 }
 0x194   :  { %v186_v45 = vadd.f32 %v185_v44, %v106_v43 }
 0x196   :  { %189 = vst.msk [vmem:[%s297_s5] sm:$0xff] %vm187_vm6, %v186_v45 }

// kernel: residual_block_1d.4
= control target key start
LH: loop header
LB: loop body
LE: loop exit
PB: predicated region body
PF: predicated region fallthrough
CT: control target
= control target key end

     0   :  { %v141_v0 = vmov 0   ;;  %s143_s23 = smov 127   ;;  %vm43_vm0 = vcmask 121856   ;;  %vm38_vm1 = vcmask 7168   ;;  %vm45_vm3 = vcmask 195584   ;;  %s190_s1 = inlined_call_operand.vmem [shape: f32[8,1], index: 1, kind: input, shape index: {}]   ;;  %s191_s2 = inlined_call_operand.vmem [shape: f32[8,1], index: 2, kind: input, shape index: {}]   ;;  %s192_s0 = inlined_call_operand.vmem [shape: f32[2,8,16], index: 0, kind: input, shape index: {}]   ;;  %s193_s3 = inlined_call_operand.vmem [shape: f32[8,24], index: 3, kind: input, shape index: {}]   ;;  %s194_s4 = inlined_call_operand.vmem [shape: f32[1,8,2], index: 4, kind: output, shape index: {}]  }
   0x1   :  { %140 = vset.pattern.permute.xlu0 %v141_v0  ;;  %v18_v1 = vld [vmem:[%s190_s1] sm:$0xff]  ;;  %v132_v8 = vld [vmem:[%s192_s0 + $0x8] sm:$0xff]  ;;  %s142_s1 = smov 1   ;;  %vm129_vm2 = vmneg %vm38_vm1  ;;  %vm69_vm4 = vcmask 130048   ;;  %vm122_vm5 = vcmask 15360  }
   0x2   :  { %23 = vperm.xlu0 %140, %v18_v1   ;;  %v19_v2 = vld [vmem:[%s191_s2] sm:$0xff] }
   0x3   :  { %v20_v4 = vld [vmem:[%s192_s0] sm:$0xff] }
   0x4   :  { %v17_v15 = vld [vmem:[%s193_s3] sm:$0xff] }
   0xa   :  { %29 = vperm.xlu0 %140, %v19_v2  }
  0x74   :  { %v24_v3 = vpop.permute.xlu0 %23 }
  0x75   :  { %v26_v5 = vmul.f32 %v24_v3, %v20_v4  ;;  %v81_v10 = vmul.f32 %v132_v8, %v24_v3 }
  0x7c   :  { %v30_v6 = vpop.permute.xlu0 %29 }
  0x7d   :  { %v32_v7 = vadd.f32 %v30_v6, %v26_v5  ;;  %v82_v11 = vadd.f32 %v81_v10, %v30_v6 }
  0x7f   :  { %v33_v9 = vmax.f32 %v32_v7, 0.0  ;;  %v83_v12 = vmax.f32 %v82_v11, 0.0 }
  0x81   :  { %35 = vrot.lane.b32.xlu2 %v33_v9, %s142_s1  ;;  %40 = vrot.lane.b32.xlu1 %v33_v9, %s143_s23 }
  0x89   :  { %85 = vrot.lane.b32.xlu2 %v83_v12, %s142_s1  ;;  %89 = vrot.lane.b32.xlu1 %v83_v12, %s143_s23 }
  0xdb   :  { %v36_v14 = vpop.permute.xlu2 %35 }
  0xe3   :  { %v86_v17 = vpop.permute.xlu2 %85 }
  0xf3   :  { %v41_v13 = vpop.permute.xlu1 %40 }
  0xf4   :  { %128 = vmatpush.msk.msra.mxu0 %vm43_vm0, %v41_v13 }
  0xf6   :  { %63 = vmatpush.msra.mxu0 %v33_v9 }
  0xf8   :  { %130 = vmatpush.msk.msra.mxu0 %vm129_vm2, %v36_v14 }
  0xf9   :  { %131 = vmatmul.msk.f32.vlgmr.msra.gmra.mxu0 %vm45_vm3, %v17_v15 }
  0xfb   :  { %v90_v16 = vpop.permute.xlu1 %89 }
  0xfc   :  { %133 = vmatpush.msk.msra.mxu1 %vm43_vm0, %v90_v16 }
  0xfe   :  { %107 = vmatpush.msra.mxu1 %v83_v12 }
 0x100   :  { %135 = vmatpush.msk.msra.mxu1 %vm129_vm2, %v86_v17 }
 0x101   :  { %136 = vmatmul.msk.f32.vlgmr.msra.gmra.mxu1 %vm45_vm3, %v17_v15 }
 0x176   :  { %v66_v18 = vpop.f32.mrf.mxu0 }
 0x177   :  { %v73_v19 = vmul.f32 %v66_v18, %v66_v18  ;;  %v70_v20 = vsel %vm69_vm4, %v66_v18, 0.0 }
 0x178   :  { %71 = vadd.xlane.f32.xlu0 %v70_v20 }
 0x179   :  { %v74_v21 = vsel %vm69_vm4, %v73_v19, 0.0 }
 0x17a   :  { %75 = vadd.xlane.f32.xlu1 %v74_v21 }
 0x17e   :  { %v110_v22 = vpop.f32.mrf.mxu1 }
 0x17f   :  { %v113_v23 = vsel %vm69_vm4, %v110_v22, 0.0  ;;  %v116_v24 = vmul.f32 %v110_v22, %v110_v22 }
 0x180   :  { %114 = vadd.xlane.f32.xlu2 %v113_v23 }
 0x181   :  { %v117_v25 = vsel %vm69_vm4, %v116_v24, 0.0 }
 0x188   :  { %118 = vadd.xlane.f32.xlu2 %v117_v25 }
 0x1eb   :  { %v72_v27 = vpop.xlane.xlu0 %71 }
 0x1ed   :  { %v76_v28 = vpop.xlane.xlu1 %75 }
 0x1ee   :  { %v77_v30 = vsel %vm38_vm1, %v72_v27, %v76_v28 }
 0x1f3   :  { %v115_v26 = vpop.xlane.xlu2 %114 }
 0x1fb   :  { %v119_v29 = vpop.xlane.xlu2 %118 }
 0x1fc   :  { %v120_v31 = vsel %vm38_vm1, %v115_v26, %v119_v29 }
 0x1fd   :  { %v121_v32 = vadd.f32 %v120_v31, %v77_v30 }
 0x1ff   :  { %123 = vst.msk [vmem:[%s194_s4] sm:$0xff] %vm122_vm5, %v121_v32 }

// kernel: residual_block_1d.5
= control target key start
LH: loop header
LB: loop body
LE: loop exit
PB: predicated region body
PF: predicated region fallthrough
CT: control target
= control target key end

     0   :  { %v284_v1 = vmov 0   ;;  %s386_s0 = inlined_call_operand.vmem [shape: f32[2,8,16], index: 0, kind: input, shape index: {}]   ;;  %s387_s1 = inlined_call_operand.vmem [shape: f32[2,4,16], index: 1, kind: input, shape index: {}]   ;;  %s388_s2 = inlined_call_operand.vmem [shape: f32[8,1], index: 2, kind: input, shape index: {}]   ;;  %s389_s3 = inlined_call_operand.vmem [shape: f32[8,1], index: 3, kind: input, shape index: {}]   ;;  %s390_s4 = inlined_call_operand.vmem [shape: f32[8,24], index: 4, kind: input, shape index: {}]   ;;  %s391_s5 = inlined_call_operand.vmem [shape: f32[8,1], index: 5, kind: input, shape index: {}]   ;;  %s392_s6 = inlined_call_operand.vmem [shape: f32[8,1], index: 6, kind: input, shape index: {}]   ;;  %s393_s7 = inlined_call_operand.vmem [shape: f32[8,4], index: 7, kind: input, shape index: {}]   ;;  %s394_s8 = inlined_call_operand.vmem [shape: f32[8,1], index: 8, kind: input, shape index: {}]   ;;  %s395_s9 = inlined_call_operand.vmem [shape: f32[8,1], index: 9, kind: input, shape index: {}]   ;;  %s396_s10 = inlined_call_operand.hbm [shape: f32[2,8,16], index: 10, kind: output, shape index: {}]  }
   0x1   :  { %v37_v0 = vld [vmem:[%s388_s2] sm:$0xff]  ;;  %255 = vset.pattern.permute.xlu0 %v284_v1  ;;  %256 = vset.pattern.permute.xlu1 %v284_v1 }
   0x2   :  { %47 = vperm.xlu0 %255, %v37_v0   ;;  %257 = vset.pattern.permute.xlu2 %v284_v1 }
   0x3   :  { %15 = vsyncpa [#allocation3], 0  ;;  %v38_v2 = vld [vmem:[%s389_s3] sm:$0xff]  ;;  %vm110_vm0 = vcmask 1043456   ;;  %vm106_vm1 = vcmask 31744   ;;  %v241_v10 = vld [vmem:[%s386_s0 + $0x8] sm:$0xff] }
   0x4   :  { %v39_v3 = vld [vmem:[%s391_s5] sm:$0xff]  ;;  %vm67_vm2 = vcmask 121856   ;;  %vm62_vm3 = vcmask 7168   ;;  %vm69_vm5 = vcmask 195584   ;;  %vm148_vm6 = vcmask 130048   ;;  %s223_s13 = sshll.u32 %s396_s10, 4  ;;  %s224_s13 = int_to_ptr.hbm [resolvable:$true] %s223_s13 }
   0x5   :  { %v43_v4 = vld [vmem:[%s395_s9] sm:$0xff]  ;;  %vm236_vm4 = vmneg %vm62_vm3  ;;  %s288_s14 = smov 128   ;;  %s289_s15 = smov 8  }
   0x6   :  { %v246_v5 = vld [vmem:[%s387_s1 + $0x4] sm:$0xf]  ;;  %v105_v7 = vld [vmem:[%s387_s1] sm:$0xf]  ;;  %s286_s1 = smov 1  }
   0x7   :  { %247 = vmatpush.msk.msra.mxu3 %vm110_vm0, %v246_v5  ;;  %v41_v6 = vld [vmem:[%s393_s7] sm:$0xff]  ;;  %239 = vmatpush.msk.msra.mxu1 %vm110_vm0, %v105_v7  ;;  %s285_s7 = smov 127  }
   0x8   :  { %248 = vmatmul.msk.f32.vlgmr.msra.gmra.mxu3 %vm106_vm1, %v41_v6  ;;  %240 = vmatmul.msk.f32.vlgmr.msra.gmra.mxu1 %vm106_vm1, %v41_v6  ;;  %v44_v9 = vld [vmem:[%s386_s0] sm:$0xff] }
   0x9   :  { %v42_v18 = vld [vmem:[%s394_s8] sm:$0xff] }
   0xa   :  { %53 = vperm.xlu0 %255, %v38_v2   ;;  %v36_v20 = vld [vmem:[%s390_s4] sm:$0xff]  ;;  %s287_s4 = smov [#allocation2]  }
   0xb   :  { %v40_v22 = vld [vmem:[%s392_s6] sm:$0xff]  ;;  %s221_s6 = sshll.u32 %s287_s4, 4  ;;  %s222_s6 = int_to_ptr.vmem [resolvable:$true] %s221_s6 }
  0x12   :  { %95 = vperm.xlu0 %255, %v39_v3  }
  0x1a   :  { %142 = vperm.xlu0 %255, %v43_v4  }
  0x74   :  { %v48_v8 = vpop.permute.xlu0 %47 }
  0x75   :  { %v50_v11 = vmul.f32 %v48_v8, %v44_v9  ;;  %v152_v12 = vmul.f32 %v241_v10, %v48_v8 }
  0x7c   :  { %v54_v13 = vpop.permute.xlu0 %53 }
  0x7d   :  { %v56_v14 = vadd.f32 %v54_v13, %v50_v11  ;;  %v153_v15 = vadd.f32 %v152_v12, %v54_v13 }
  0x7f   :  { %v57_v16 = vmax.f32 %v56_v14, 0.0  ;;  %v154_v17 = vmax.f32 %v153_v15, 0.0 }
  0x81   :  { %64 = vrot.lane.b32.xlu2 %v57_v16, %s285_s7  ;;  %160 = vrot.lane.b32.xlu1 %v154_v17, %s285_s7 }
  0x84   :  { %v96_v25 = vpop.permute.xlu0 %95 }
  0x85   :  { %v131_v26 = vpop.f32.mrf.mxu1 }
  0x89   :  { %59 = vrot.lane.b32.xlu2 %v57_v16, %s286_s1  ;;  %156 = vrot.lane.b32.xlu1 %v154_v17, %s286_s1 }
  0x8b   :  { %v208_v37 = vpop.f32.mrf.mxu3 }
  0x8c   :  { %v143_v32 = vpop.permute.xlu0 %142 }
  0x91   :  { %136 = vperm.xlu1 %256, %v42_v18   ;;  %101 = vperm.xlu2 %257, %v40_v22  }
  0xdb   :  { %v65_v19 = vpop.permute.xlu2 %64 }
  0xdc   :  { %235 = vmatpush.msk.msra.mxu0 %vm67_vm2, %v65_v19 }
  0xde   :  { %87 = vmatpush.msra.mxu0 %v57_v16 }
  0xe3   :  { %v60_v21 = vpop.permute.xlu2 %59 }
  0xe4   :  { %237 = vmatpush.msk.msra.mxu0 %vm236_vm4, %v60_v21 }
  0xe5   :  { %238 = vmatmul.msk.f32.vlgmr.msra.gmra.mxu0 %vm69_vm5, %v36_v20 }
  0xeb   :  { %v102_v30 = vpop.permute.xlu2 %101 }
  0xf3   :  { %v161_v23 = vpop.permute.xlu1 %160 }
  0xf4   :  { %242 = vmatpush.msk.msra.mxu2 %vm67_vm2, %v161_v23 }
  0xf6   :  { %178 = vmatpush.msra.mxu2 %v154_v17 }
  0xfb   :  { %v157_v24 = vpop.permute.xlu1 %156 }
  0xfc   :  { %244 = vmatpush.msk.msra.mxu2 %vm236_vm4, %v157_v24 }
  0xfd   :  { %245 = vmatmul.msk.f32.vlgmr.msra.gmra.mxu2 %vm69_vm5, %v36_v20 }
 0x103   :  { %v137_v27 = vpop.permute.xlu1 %136 }
 0x104   :  { %v139_v28 = vmul.f32 %v137_v27, %v131_v26  ;;  %v211_v38 = vmul.f32 %v208_v37, %v137_v27 }
 0x106   :  { %v145_v33 = vadd.f32 %v143_v32, %v139_v28  ;;  %v212_v41 = vadd.f32 %v211_v38, %v143_v32 }
 0x162   :  { %v90_v29 = vpop.f32.mrf.mxu0 }
 0x163   :  { %v98_v31 = vmul.f32 %v96_v25, %v90_v29 }
 0x165   :  { %v104_v34 = vadd.f32 %v102_v30, %v98_v31 }
 0x167   :  { %v146_v35 = vadd.f32 %v145_v33, %v104_v34 }
 0x169   :  { %v147_v36 = vmax.f32 %v146_v35, 0.0 }
 0x16b   :  { %149 = vst.msk [vmem:[#allocation2] sm:$0xff] %vm148_vm6, %v147_v36 }
 0x180   :  { %v181_v39 = vpop.f32.mrf.mxu2 }
 0x181   :  { %v184_v40 = vmul.f32 %v181_v39, %v96_v25 }
 0x183   :  { %v185_v42 = vadd.f32 %v184_v40, %v102_v30 }
 0x185   :  { %v213_v43 = vadd.f32 %v212_v41, %v185_v42 }
 0x187   :  { %v214_v44 = vmax.f32 %v213_v43, 0.0 }
 0x189   :  { %216 = vst.msk [vmem:[#allocation2 + $0x8] sm:$0xff] %vm148_vm6, %v214_v44 }
 0x18a   :  { %229 = dma.vmem_to_hbm [thread:$0]  %s222_s6, 256, %s224_s13, [#allocation3], %s288_s14, %s288_s14, %s289_s15  }
 0x18b   :  { %282 = dma.done.wait [#allocation3], 256  }
 0x18c   :  { %283 = vsyncadd [#allocation3], 4294967040 }
 0x18d   :  { %234 = vsyncpa [#allocation3], 1 }

</bundles_post_ra>
